<compile_context>
chip_gen: v5e
topology: v5e:2x2
jax: 0.10.0
libtpu: 0.0.40
codegen_flags: <defaults>
</compile_context>

<pallas_src>
import jax
import jax.numpy as jnp
from jax.experimental import pallas as pl
from jax.experimental.pallas import tpu as pltpu

MATMUL_DTYPE = jnp.bfloat16


def _round_up(a, b):
    return ((a + b - 1) // b) * b


def _vmem_ceiling_bytes():
    try:
        cap = int(pltpu.get_tpu_info().vmem_capacity_bytes)
    except Exception:
        cap = 64 << 20  # conservative default (v7x-sized part)
    # ~22% headroom for Mosaic internal scratch / semaphores:
    #   64 MiB part (v7x)      -> ~50 MiB usable
    #   128 MiB part (v5e/v6e) -> ~100 MiB usable
    return int(cap * 0.78)


_VMEM_CEIL = _vmem_ceiling_bytes()


def _largest_div_tile(total, cap, unit=128):
    """Largest multiple of `unit` that divides `total` and is <= cap (>= unit)."""
    t = min(total, max(unit, (int(cap) // unit) * unit))
    t = max(unit, (t // unit) * unit)
    while total % t != 0:
        t -= unit
    return max(t, unit)


# ----------------------------------------------------------------------------
# Kernels
# ----------------------------------------------------------------------------
def mae_fused_kernel(x_ref, w1_ref, b1_ref, w2_ref, b2_ref, o_ref, h_ref):
    """Grid = (row tiles i, decoder-output tiles j); j innermost & sequential."""
    j = pl.program_id(1)

    # Encoder runs once per row tile (first decoder-output tile); the bf16
    # activation is cached in VMEM scratch and reused for every j.
    @pl.when(j == 0)
    def _encode():
        x = x_ref[...].astype(w1_ref.dtype)   # in-kernel bf16 cast (VPU, hides under MXU)
        h = jnp.dot(x, w1_ref[...], preferred_element_type=jnp.float32)
        h = jnp.maximum(h + b1_ref[...], 0.0)            # bias + ReLU in f32
        h_ref[...] = h.astype(h_ref.dtype)

    # Decoder tile: y = sigmoid(h @ W2_tile + b2_tile), f32 accumulate/epilogue.
    y = jnp.dot(h_ref[...], w2_ref[...], preferred_element_type=jnp.float32)
    y = y + b2_ref[...]
    # sigmoid(y) == 0.5*(tanh(0.5*y)+1): one EUP push instead of exp + divide.
    o_ref[...] = (0.5 * (jnp.tanh(0.5 * y) + 1.0)).astype(o_ref.dtype)


def encoder_kernel(x_ref, w1_ref, b1_ref, h_ref, acc_ref):
    """K-tiled encoder fallback: grid = (row tiles i, K tiles k); k innermost."""
    k = pl.program_id(1)

    @pl.when(k == 0)
    def _init():
        acc_ref[...] = jnp.zeros_like(acc_ref)

    x = x_ref[...].astype(w1_ref.dtype)
    acc_ref[...] += jnp.dot(x, w1_ref[...], preferred_element_type=jnp.float32)

    @pl.when(k == pl.num_programs(1) - 1)
    def _finish():
        h = jnp.maximum(acc_ref[...] + b1_ref[...], 0.0)
        h_ref[...] = h.astype(h_ref.dtype)


def decoder_kernel(h_ref, w2_ref, b2_ref, o_ref):
    y = jnp.dot(h_ref[...], w2_ref[...], preferred_element_type=jnp.float32)
    y = y + b2_ref[...]
    o_ref[...] = (0.5 * (jnp.tanh(0.5 * y) + 1.0)).astype(o_ref.dtype)


# ----------------------------------------------------------------------------
# Host-side wrappers
# ----------------------------------------------------------------------------
def prepare_params(w1, b1, w2, b2, matmul_dtype=MATMUL_DTYPE):
    """Pad + cast weights ONCE (hoisted out of the per-call path)."""
    D, HIDDEN = w1.shape
    D_pad = _round_up(D, 128)
    H_pad = _round_up(HIDDEN, 128)
    w1_p = jnp.zeros((D_pad, H_pad), matmul_dtype).at[:D, :HIDDEN].set(
        w1.astype(matmul_dtype))
    b1_p = jnp.zeros((1, H_pad), jnp.float32).at[:, :HIDDEN].set(
        b1.reshape(1, HIDDEN).astype(jnp.float32))
    w2_p = jnp.zeros((H_pad, D_pad), matmul_dtype).at[:HIDDEN, :D].set(
        w2.astype(matmul_dtype))
    b2_p = jnp.zeros((1, D_pad), jnp.float32).at[:, :D].set(
        b2.reshape(1, D).astype(jnp.float32))
    return w1_p, b1_p, w2_p, b2_p


@jax.jit
def masked_autoencoder(x_nchw, w1_p, b1_p, w2_p, b2_p):
    """x_nchw: (N,C,H,W) float32; weights pre-padded/cast by prepare_params."""
    N, C, H, W = x_nchw.shape
    D = C * H * W
    D_pad, H_pad = w1_p.shape
    bpe = jnp.dtype(MATMUL_DTYPE).itemsize

    # ------------------------------ tiling ----------------------------------
    def fused_fixed_bytes(tm):
        return (2 * D_pad * H_pad * bpe          # W1, counted double-buffered (conservative)
                + 2 * H_pad * 4 + 2 * D_pad * 4  # biases (f32, double-buffered)
                + 2 * tm * D_pad * 4             # x row tile (f32, double-buffered)
                + tm * H_pad * bpe)              # cached-h scratch

    def per_out_col_bytes(tm):
        # W2 column + b2 column + output column, all double-buffered.
        return 2 * H_pad * bpe + 2 * 4 + 2 * tm * 4

    tm_candidates = []
    if N >= 256:
        tm_candidates.append(256)      # fills 2x256^2 MXU on v6e/v7x
    if N >= 128:
        tm_candidates.append(128)
    tm_candidates.append(_round_up(min(max(N, 1), 128), 16))  # bf16 sublane packing

    TM = None
    use_fused = False
    for tm in tm_candidates:
        if fused_fixed_bytes(tm) + 128 * per_out_col_bytes(tm) <= _VMEM_CEIL:
            TM, use_fused = tm, True
            break
    if TM is None:
        TM = 128 if N >= 128 else _round_up(max(N, 1), 16)

    M_pad = _round_up(N, TM)

    # ------------------------------ pad x (stays f32) -----------------------
    x2d = x_nchw.reshape(N, D)
    if (N, D) == (M_pad, D_pad):
        x_p = x2d
    else:
        x_p = jnp.zeros((M_pad, D_pad), x2d.dtype).at[:N, :D].set(x2d)

    flops = 4 * M_pad * D_pad * H_pad            # two matmuls
    transcendentals = M_pad * D_pad              # one tanh per output element
    bytes_accessed = (M_pad * D_pad * 4          # x
                      + 2 * D_pad * H_pad * bpe  # W1 + W2
                      + (H_pad + D_pad) * 4      # biases
                      + M_pad * D_pad * 4)       # out
    cost = pl.CostEstimate(flops=flops, transcendentals=transcendentals,
                           bytes_accessed=bytes_accessed)

    if use_fused:
        # --------------------- fused encoder+decoder ------------------------
        cap_cols = (_VMEM_CEIL - fused_fixed_bytes(TM)) // per_out_col_bytes(TM)
        TN = _largest_div_tile(D_pad, min(cap_cols, 4096))
        est = fused_fixed_bytes(TM) + TN * per_out_col_bytes(TM)
        vmem_limit = int(min(_VMEM_CEIL, max(int(1.25 * est), 32 << 20)))
        grid = (M_pad // TM, D_pad // TN)

        out2d = pl.pallas_call(
            mae_fused_kernel,
            out_shape=jax.ShapeDtypeStruct((M_pad, D_pad), jnp.float32),
            grid_spec=pltpu.PrefetchScalarGridSpec(
                num_scalar_prefetch=0,
                grid=grid,
                in_specs=[
                    pl.BlockSpec((TM, D_pad), lambda i, j: (i, 0)),      # x rows (f32)
                    pl.BlockSpec((D_pad, H_pad), lambda i, j: (0, 0)),   # W1 (resident)
                    pl.BlockSpec((1, H_pad), lambda i, j: (0, 0)),       # b1
                    pl.BlockSpec((H_pad, TN), lambda i, j: (0, j)),      # W2 tile
                    pl.BlockSpec((1, TN), lambda i, j: (0, j)),          # b2 tile
                ],
                out_specs=pl.BlockSpec((TM, TN), lambda i, j: (i, j)),
                scratch_shapes=[pltpu.VMEM((TM, H_pad), MATMUL_DTYPE)],  # cached h
            ),
            compiler_params=pltpu.CompilerParams(
                # NOTE: the cached-h pattern requires axis 1 to stay innermost
                # and sequential ("arbitrary").
                dimension_semantics=("parallel", "arbitrary"),
                vmem_limit_bytes=vmem_limit,
            ),
            cost_estimate=cost,
        )(x_p, w1_p, b1_p, w2_p, b2_p)
    else:
        # ------------- K-tiled fallback: encoder then decoder ---------------
        enc_fixed = (2 * TM * H_pad * bpe      # h output tile (double-buffered)
                     + TM * H_pad * 4          # f32 accumulator scratch
                     + 2 * H_pad * 4)          # b1
        per_k_col = 2 * TM * 4 + 2 * H_pad * bpe   # x col (f32) + W1 row, double-buffered
        TK = _largest_div_tile(
            D_pad, min(max((_VMEM_CEIL - enc_fixed) // per_k_col, 128), 4096))
        enc_est = enc_fixed + TK * per_k_col
        enc_vmem = int(min(_VMEM_CEIL, max(int(1.25 * enc_est), 32 << 20)))

        h_p = pl.pallas_call(
            encoder_kernel,
            out_shape=jax.ShapeDtypeStruct((M_pad, H_pad), MATMUL_DTYPE),
            grid_spec=pltpu.PrefetchScalarGridSpec(
                num_scalar_prefetch=0,
                grid=(M_pad // TM, D_pad // TK),
                in_specs=[
                    pl.BlockSpec((TM, TK), lambda i, k: (i, k)),       # x K-tile (f32)
                    pl.BlockSpec((TK, H_pad), lambda i, k: (k, 0)),    # W1 K-tile
                    pl.BlockSpec((1, H_pad), lambda i, k: (0, 0)),     # b1
                ],
                out_specs=pl.BlockSpec((TM, H_pad), lambda i, k: (i, 0)),
                scratch_shapes=[pltpu.VMEM((TM, H_pad), jnp.float32)],  # f32 acc
            ),
            compiler_params=pltpu.CompilerParams(
                dimension_semantics=("parallel", "arbitrary"),
                vmem_limit_bytes=enc_vmem,
            ),
            cost_estimate=cost,
        )(x_p, w1_p, b1_p)

        dec_fixed = 2 * TM * H_pad * bpe       # h input rows, double-buffered
        per_col = per_out_col_bytes(TM)
        TN = _largest_div_tile(
            D_pad, min(max((_VMEM_CEIL - dec_fixed) // per_col, 128), 4096))
        dec_est = dec_fixed + TN * per_col
        dec_vmem = int(min(_VMEM_CEIL, max(int(1.25 * dec_est), 32 << 20)))

        out2d = pl.pallas_call(
            decoder_kernel,
            out_shape=jax.ShapeDtypeStruct((M_pad, D_pad), jnp.float32),
            grid_spec=pltpu.PrefetchScalarGridSpec(
                num_scalar_prefetch=0,
                grid=(M_pad // TM, D_pad // TN),
                in_specs=[
                    pl.BlockSpec((TM, H_pad), lambda i, j: (i, 0)),    # h rows
                    pl.BlockSpec((H_pad, TN), lambda i, j: (0, j)),    # W2 tile
                    pl.BlockSpec((1, TN), lambda i, j: (0, j)),        # b2 tile
                ],
                out_specs=pl.BlockSpec((TM, TN), lambda i, j: (i, j)),
            ),
            compiler_params=pltpu.CompilerParams(
                dimension_semantics=("parallel", "parallel"),
                vmem_limit_bytes=dec_vmem,
            ),
            cost_estimate=cost,
        )(h_p, w2_p, b2_p)

    return out2d[:N, :D].reshape(N, C, H, W)


if __name__ == "__main__":
    # Small shapes consistent with the module's forward: NCHW image input.
    N, C, H, W = 2, 4, 16, 16
    D = C * H * W          # 1024
    HIDDEN = 32

    key = jax.random.PRNGKey(0)
    kx, kw1, kb1, kw2, kb2 = jax.random.split(key, 5)

    x = jax.random.normal(kx, (N, C, H, W), dtype=jnp.float32)

    # Deterministic parameter init (nn.Linear-like scaling), stored as
    # (in, out) so the kernel computes x @ W + b directly.
    w1 = jax.random.uniform(kw1, (D, HIDDEN), jnp.float32, -1.0, 1.0) / jnp.sqrt(D)
    b1 = jax.random.uniform(kb1, (HIDDEN,), jnp.float32, -1.0, 1.0) / jnp.sqrt(D)
    w2 = jax.random.uniform(kw2, (HIDDEN, D), jnp.float32, -1.0, 1.0) / jnp.sqrt(HIDDEN)
    b2 = jax.random.uniform(kb2, (D,), jnp.float32, -1.0, 1.0) / jnp.sqrt(HIDDEN)

    # Pad/cast weights once (hoisted out of the per-call path).
    params = prepare_params(w1, b1, w2, b2)

    out = masked_autoencoder(x, *params)
    jax.block_until_ready(out)
    assert out.shape == (N, C, H, W)

    # Reference mirroring the kernel's precision (bf16 MXU operands, f32
    # accumulation / epilogue) — tight correctness check.
    x2d = x.reshape(N, D)
    h_ref = jnp.maximum(
        jnp.dot(x2d.astype(jnp.bfloat16), w1.astype(jnp.bfloat16),
                preferred_element_type=jnp.float32) + b1, 0.0)
    y_ref = jax.nn.sigmoid(
        jnp.dot(h_ref.astype(jnp.bfloat16), w2.astype(jnp.bfloat16),
                preferred_element_type=jnp.float32) + b2).reshape(N, C, H, W)
    assert jnp.allclose(out, y_ref, atol=1e-2), "mismatch vs bf16-mirrored reference"

    # Loose semantic check against the pure-f32 module forward.
    h32 = jnp.maximum(x2d @ w1 + b1, 0.0)
    y32 = jax.nn.sigmoid(h32 @ w2 + b2).reshape(N, C, H, W)
    assert jnp.allclose(out, y32, atol=5e-2), "mismatch vs f32 reference"

    print("KERNEL_OK")
</pallas_src>

<mosaic_0001>
module attributes {stable_mosaic.version = 11 : i64} {
  func.func @mae_fused_kernel(%arg0: i32, %arg1: i32, %arg2: memref<16x1024xf32, #tpu.memory_space<vmem>>, %arg3: memref<1024x128xbf16, #tpu.memory_space<vmem>>, %arg4: memref<1x128xf32, #tpu.memory_space<vmem>>, %arg5: memref<128x1024xbf16, #tpu.memory_space<vmem>>, %arg6: memref<1x1024xf32, #tpu.memory_space<vmem>>, %arg7: memref<16x1024xf32, #tpu.memory_space<vmem>>, %arg8: memref<16x128xbf16, #tpu.memory_space<vmem>>) attributes {dimension_semantics = [#tpu.dimension_semantics<parallel>, #tpu.dimension_semantics<arbitrary>], iteration_bounds = array<i64: 1, 1>, scalar_prefetch = 0 : i64, scratch_operands = 1 : i64, tpu.core_type = #tpu.core_type<tc>, window_params = [{transform_indices = @transform_0, window_bounds = array<i64: 16, 1024>}, {pipeline_mode = #tpu.pipeline_mode<synchronous>, transform_indices = @transform_1, window_bounds = array<i64: 1024, 128>}, {pipeline_mode = #tpu.pipeline_mode<synchronous>, transform_indices = @transform_2, window_bounds = array<i64: 1, 128>}, {transform_indices = @transform_3, window_bounds = array<i64: 128, 1024>}, {transform_indices = @transform_4, window_bounds = array<i64: 1, 1024>}, {transform_indices = @transform_5, window_bounds = array<i64: 16, 1024>}]} {
    %c0_i32 = arith.constant 0 : i32
    %0 = arith.cmpi eq, %arg1, %c0_i32 : i32
    %1 = arith.extui %0 : i1 to i32
    %c0_i32_0 = arith.constant 0 : i32
    %2 = arith.cmpi ne, %1, %c0_i32_0 : i32
    scf.if %2 {
      %c0_11 = arith.constant 0 : index
      %c0_12 = arith.constant 0 : index
      %17 = vector.load %arg2[%c0_11, %c0_12] : memref<16x1024xf32, #tpu.memory_space<vmem>>, vector<16x1024xf32>
      %18 = arith.truncf %17 : vector<16x1024xf32> to vector<16x1024xbf16>
      %c0_13 = arith.constant 0 : index
      %c0_14 = arith.constant 0 : index
      %19 = vector.load %arg3[%c0_13, %c0_14] : memref<1024x128xbf16, #tpu.memory_space<vmem>>, vector<1024x128xbf16>
      %cst_15 = arith.constant dense<0.000000e+00> : vector<16x128xf32>
      %20 = tpu.matmul %18, %19, %cst_15 {dimension_numbers = #tpu.dot_dimension_numbers<[1], [0], [0], [1], [0, 0, 1, 1], [], []>} : vector<16x1024xbf16>, vector<1024x128xbf16>, vector<16x128xf32> -> vector<16x128xf32>
      %c0_16 = arith.constant 0 : index
      %c0_17 = arith.constant 0 : index
      %21 = vector.load %arg4[%c0_16, %c0_17] : memref<1x128xf32, #tpu.memory_space<vmem>>, vector<1x128xf32>
      %22 = vector.broadcast %21 : vector<1x128xf32> to vector<16x128xf32>
      %23 = arith.addf %20, %22 : vector<16x128xf32>
      %cst_18 = arith.constant 0.000000e+00 : f32
      %24 = vector.broadcast %cst_18 : f32 to vector<16x128xf32>
      %25 = arith.maximumf %23, %24 : vector<16x128xf32>
      %26 = arith.truncf %25 : vector<16x128xf32> to vector<16x128xbf16>
      %c0_19 = arith.constant 0 : index
      %c0_20 = arith.constant 0 : index
      %27 = vector.load %arg8[%c0_19, %c0_20] : memref<16x128xbf16, #tpu.memory_space<vmem>>, vector<16x128xbf16>
      tpu.vector_store %arg8[%c0_19, %c0_20], %26 {strides = array<i32>} : memref<16x128xbf16, #tpu.memory_space<vmem>>, vector<16x128xbf16>,
    } else {
    }
    %c0 = arith.constant 0 : index
    %c0_1 = arith.constant 0 : index
    %3 = vector.load %arg8[%c0, %c0_1] : memref<16x128xbf16, #tpu.memory_space<vmem>>, vector<16x128xbf16>
    %c0_2 = arith.constant 0 : index
    %c0_3 = arith.constant 0 : index
    %4 = vector.load %arg5[%c0_2, %c0_3] : memref<128x1024xbf16, #tpu.memory_space<vmem>>, vector<128x1024xbf16>
    %cst = arith.constant dense<0.000000e+00> : vector<16x1024xf32>
    %5 = tpu.matmul %3, %4, %cst {dimension_numbers = #tpu.dot_dimension_numbers<[1], [0], [0], [1], [0, 0, 1, 1], [], []>} : vector<16x128xbf16>, vector<128x1024xbf16>, vector<16x1024xf32> -> vector<16x1024xf32>
    %c0_4 = arith.constant 0 : index
    %c0_5 = arith.constant 0 : index
    %6 = vector.load %arg6[%c0_4, %c0_5] : memref<1x1024xf32, #tpu.memory_space<vmem>>, vector<1x1024xf32>
    %7 = vector.broadcast %6 : vector<1x1024xf32> to vector<16x1024xf32>
    %8 = arith.addf %5, %7 : vector<16x1024xf32>
    %cst_6 = arith.constant 5.000000e-01 : f32
    %9 = vector.broadcast %cst_6 : f32 to vector<16x1024xf32>
    %10 = arith.mulf %9, %8 : vector<16x1024xf32>
    %11 = math.tanh %10 : vector<16x1024xf32>
    %cst_7 = arith.constant 1.000000e+00 : f32
    %12 = vector.broadcast %cst_7 : f32 to vector<16x1024xf32>
    %13 = arith.addf %11, %12 : vector<16x1024xf32>
    %cst_8 = arith.constant 5.000000e-01 : f32
    %14 = vector.broadcast %cst_8 : f32 to vector<16x1024xf32>
    %15 = arith.mulf %14, %13 : vector<16x1024xf32>
    %c0_9 = arith.constant 0 : index
    %c0_10 = arith.constant 0 : index
    %16 = vector.load %arg7[%c0_9, %c0_10] : memref<16x1024xf32, #tpu.memory_space<vmem>>, vector<16x1024xf32>
    tpu.vector_store %arg7[%c0_9, %c0_10], %15 {strides = array<i32>} : memref<16x1024xf32, #tpu.memory_space<vmem>>, vector<16x1024xf32>,
    return
  }
  func.func @transform_0(%arg0: i32, %arg1: i32) -> (i32, i32) {
    %c0_i32 = arith.constant 0 : i32
    %c0_i32_0 = arith.constant 0 : i32
    return %arg0, %c0_i32 : i32, i32
  }
  func.func @transform_1(%arg0: i32, %arg1: i32) -> (i32, i32) {
    %c0_i32 = arith.constant 0 : i32
    %c0_i32_0 = arith.constant 0 : i32
    %c0_i32_1 = arith.constant 0 : i32
    return %c0_i32, %c0_i32_0 : i32, i32
  }
  func.func @transform_2(%arg0: i32, %arg1: i32) -> (i32, i32) {
    %c0_i32 = arith.constant 0 : i32
    %c0_i32_0 = arith.constant 0 : i32
    %c0_i32_1 = arith.constant 0 : i32
    return %c0_i32, %c0_i32_0 : i32, i32
  }
  func.func @transform_3(%arg0: i32, %arg1: i32) -> (i32, i32) {
    %c0_i32 = arith.constant 0 : i32
    %c0_i32_0 = arith.constant 0 : i32
    return %c0_i32, %arg1 : i32, i32
  }
  func.func @transform_4(%arg0: i32, %arg1: i32) -> (i32, i32) {
    %c0_i32 = arith.constant 0 : i32
    %c0_i32_0 = arith.constant 0 : i32
    return %c0_i32, %arg1 : i32, i32
  }
  func.func @transform_5(%arg0: i32, %arg1: i32) -> (i32, i32) {
    %c0_i32 = arith.constant 0 : i32
    return %arg0, %arg1 : i32, i32
  }
}

</mosaic_0001>

<bundles_post_ra>
// kernel: masked_autoencoder.1
= control target key start
LH: loop header
LB: loop body
LE: loop exit
PB: predicated region body
PF: predicated region fallthrough
CT: control target
= control target key end

     0   :  { %10 = vsyncpa [#allocation4], 0  ;;  %s2224_s0 = inlined_call_operand.vmem [shape: f32[16,1024], index: 0, kind: input, shape index: {}]   ;;  %s2225_s1 = inlined_call_operand.hbm [shape: bf16[1024,128], index: 1, kind: input, shape index: {}]   ;;  %s2226_s2 = inlined_call_operand.vmem [shape: f32[1,128], index: 2, kind: input, shape index: {}]   ;;  %s2227_s3 = inlined_call_operand.hbm [shape: bf16[128,1024], index: 3, kind: input, shape index: {}]   ;;  %s2228_s4 = inlined_call_operand.vmem [shape: f32[1,1024], index: 4, kind: input, shape index: {}]   ;;  %s2229_s5 = inlined_call_operand.vmem [shape: f32[16,1024], index: 5, kind: output, shape index: {}]  }
   0x1   :  { %s18_s20 = sshll.u32 %s2225_s1, 4  ;;  %s19_s20 = int_to_ptr.hbm [resolvable:$true] %s18_s20 }
   0x2   :  { %11 = vsyncpa [#allocation6], 0  ;;  %s2063_s21 = smov [#allocation3]   ;;  %s33_s25 = sshll.u32 %s2227_s3, 4  ;;  %s34_s25 = int_to_ptr.hbm [resolvable:$true] %s33_s25 }
   0x3   :  { %s20_s22 = sshll.u32 %s2063_s21, 4  ;;  %s2064_s26 = smov 64   ;;  %s21_s22 = int_to_ptr.vmem [resolvable:$true] %s20_s22 }
   0x4   :  { %s2065_s27 = smov 4   ;;  %s2066_s28 = smov [#allocation5]  }
   0x5   :  { %26 = dma.hbm_to_vmem [thread:$0]  %s19_s20, 8192, %s21_s22, [#allocation4], %s2064_s26, %s2064_s26, %s2065_s27  }
   0x6   :  { %s35_s29 = sshll.u32 %s2066_s28, 4  ;;  %s2067_s30 = smov 512   ;;  %s36_s29 = int_to_ptr.vmem [resolvable:$true] %s35_s29 }
   0x7   :  { %s2068_s6 = smov 32  }
   0x8   :  { %41 = dma.hbm_to_vmem [thread:$0]  %s34_s25, 8192, %s36_s29, [#allocation6], %s2067_s30, %s2067_s30, %s2068_s6  }
   0x9   :  { %2059 = dma.done.wait [#allocation4], 8192  }
   0xa   :  { %2060 = vsyncadd [#allocation4], 4294959104 }
   0xb   :  { %2061 = dma.done.wait [#allocation6], 8192  }
   0xc   :  { %2062 = vsyncadd [#allocation6], 4294959104  ;;  %v1845_v0 = vld [vmem:[#allocation3 + $0x38] sm:$0xff]  ;;  %v1844_v4 = vld [vmem:[#allocation3 + $0x30] sm:$0xff] }
   0xd   :  { %v1853_v1 = vld [vmem:[#allocation3 + $0x78] sm:$0xff]  ;;  %596 = vmatpush.bf16.msra.mxu0 %v1845_v0  ;;  %v1852_v5 = vld [vmem:[#allocation3 + $0x70] sm:$0xff]  ;;  %v1843_v8 = vld [vmem:[#allocation3 + $0x28] sm:$0xff] }
   0xe   :  { %v1861_v2 = vld [vmem:[#allocation3 + $0xb8] sm:$0xff]  ;;  %610 = vmatpush.bf16.msra.mxu1 %v1853_v1  ;;  %v1860_v6 = vld [vmem:[#allocation3 + $0xb0] sm:$0xff]  ;;  %v1851_v9 = vld [vmem:[#allocation3 + $0x68] sm:$0xff] }
   0xf   :  { %v1869_v3 = vld [vmem:[#allocation3 + $0xf8] sm:$0xff]  ;;  %624 = vmatpush.bf16.msra.mxu2 %v1861_v2  ;;  %v1868_v7 = vld [vmem:[#allocation3 + $0xf0] sm:$0xff]  ;;  %v1859_v10 = vld [vmem:[#allocation3 + $0xa8] sm:$0xff] }
  0x10   :  { %638 = vmatpush.bf16.msra.mxu3 %v1869_v3  ;;  %v1867_v11 = vld [vmem:[#allocation3 + $0xe8] sm:$0xff]  ;;  %v1842_v12 = vld [vmem:[#allocation3 + $0x20] sm:$0xff]  ;;  %v1841_v16 = vld [vmem:[#allocation3 + $0x18] sm:$0xff] }
  0x11   :  { %597 = vmatpush.bf16.msra.mxu0 %v1844_v4  ;;  %v1850_v13 = vld [vmem:[#allocation3 + $0x60] sm:$0xff]  ;;  %v1849_v17 = vld [vmem:[#allocation3 + $0x58] sm:$0xff]  ;;  %v1840_v20 = vld [vmem:[#allocation3 + $0x10] sm:$0xff] }
  0x12   :  { %611 = vmatpush.bf16.msra.mxu1 %v1852_v5  ;;  %v1858_v14 = vld [vmem:[#allocation3 + $0xa0] sm:$0xff]  ;;  %v1857_v18 = vld [vmem:[#allocation3 + $0x98] sm:$0xff]  ;;  %v1848_v21 = vld [vmem:[#allocation3 + $0x50] sm:$0xff] }
  0x13   :  { %625 = vmatpush.bf16.msra.mxu2 %v1860_v6  ;;  %v1866_v15 = vld [vmem:[#allocation3 + $0xe0] sm:$0xff]  ;;  %v1865_v19 = vld [vmem:[#allocation3 + $0xd8] sm:$0xff]  ;;  %v1856_v22 = vld [vmem:[#allocation3 + $0x90] sm:$0xff] }
  0x14   :  { %639 = vmatpush.bf16.msra.mxu3 %v1868_v7  ;;  %v1864_v23 = vld [vmem:[#allocation3 + $0xd0] sm:$0xff]  ;;  %v1839_v24 = vld [vmem:[#allocation3 + $0x8] sm:$0xff]  ;;  %v1838_v28 = vld [vmem:[#allocation3] sm:$0xff] }
  0x15   :  { %598 = vmatpush.bf16.msra.mxu0 %v1843_v8  ;;  %v1847_v25 = vld [vmem:[#allocation3 + $0x48] sm:$0xff]  ;;  %v1846_v29 = vld [vmem:[#allocation3 + $0x40] sm:$0xff]  ;;  %v1877_v32 = vld [vmem:[#allocation3 + $0x138] sm:$0xff] }
  0x16   :  { %612 = vmatpush.bf16.msra.mxu1 %v1851_v9  ;;  %v1855_v26 = vld [vmem:[#allocation3 + $0x88] sm:$0xff]  ;;  %v1854_v30 = vld [vmem:[#allocation3 + $0x80] sm:$0xff]  ;;  %v1885_v33 = vld [vmem:[#allocation3 + $0x178] sm:$0xff] }
  0x17   :  { %626 = vmatpush.bf16.msra.mxu2 %v1859_v10  ;;  %v1863_v27 = vld [vmem:[#allocation3 + $0xc8] sm:$0xff]  ;;  %v1862_v31 = vld [vmem:[#allocation3 + $0xc0] sm:$0xff]  ;;  %v56_v36 = vld [vmem:[%s2224_s0] sm:$0xff] }
  0x18   :  { %640 = vmatpush.bf16.msra.mxu3 %v1867_v11  ;;  %v58_v34 = vld [vmem:[%s2224_s0 + $0x10] sm:$0xff]  ;;  %v64_v37 = vld [vmem:[%s2224_s0 + $0x40] sm:$0xff]  ;;  %v59_v38 = vld [vmem:[%s2224_s0 + $0x18] sm:$0xff] }
  0x19   :  { %599 = vmatpush.bf16.msra.mxu0 %v1842_v12  ;;  %v66_v35 = vld [vmem:[%s2224_s0 + $0x50] sm:$0xff]  ;;  %v67_v39 = vld [vmem:[%s2224_s0 + $0x58] sm:$0xff]  ;;  %v57_v40 = vld [vmem:[%s2224_s0 + $0x8] sm:$0xff]  ;;  %v72_v45 = vpack.c.bf16 %v64_v37, %v56_v36 }
  0x1a   :  { %613 = vmatpush.bf16.msra.mxu1 %v1850_v13  ;;  %v65_v41 = vld [vmem:[%s2224_s0 + $0x48] sm:$0xff]  ;;  %v1893_v42 = vld [vmem:[#allocation3 + $0x1b8] sm:$0xff]  ;;  %v74_v44 = vpack.c.bf16 %v66_v35, %v58_v34  ;;  %v75_v46 = vpack.c.bf16 %v67_v39, %v59_v38  ;;  %v1876_v48 = vld [vmem:[#allocation3 + $0x130] sm:$0xff] }
  0x1b   :  { %627 = vmatpush.bf16.msra.mxu2 %v1858_v14  ;;  %v1901_v43 = vld [vmem:[#allocation3 + $0x1f8] sm:$0xff]  ;;  %v73_v47 = vpack.c.bf16 %v65_v41, %v57_v40  ;;  %v1884_v49 = vld [vmem:[#allocation3 + $0x170] sm:$0xff]  ;;  %v1875_v52 = vld [vmem:[#allocation3 + $0x128] sm:$0xff] }
  0x1c   :  { %641 = vmatpush.bf16.msra.mxu3 %v1866_v15  ;;  %v1892_v50 = vld [vmem:[#allocation3 + $0x1b0] sm:$0xff]  ;;  %v1883_v53 = vld [vmem:[#allocation3 + $0x168] sm:$0xff]  ;;  %v1874_v56 = vld [vmem:[#allocation3 + $0x120] sm:$0xff] }
  0x1d   :  { %600 = vmatpush.bf16.msra.mxu0 %v1841_v16  ;;  %v1900_v51 = vld [vmem:[#allocation3 + $0x1f0] sm:$0xff]  ;;  %v1891_v54 = vld [vmem:[#allocation3 + $0x1a8] sm:$0xff]  ;;  %v1882_v57 = vld [vmem:[#allocation3 + $0x160] sm:$0xff] }
  0x1e   :  { %614 = vmatpush.bf16.msra.mxu1 %v1849_v17  ;;  %v1899_v55 = vld [vmem:[#allocation3 + $0x1e8] sm:$0xff]  ;;  %v1890_v58 = vld [vmem:[#allocation3 + $0x1a0] sm:$0xff]  ;;  %v1873_v60 = vld [vmem:[#allocation3 + $0x118] sm:$0xff] }
  0x1f   :  { %628 = vmatpush.bf16.msra.mxu2 %v1857_v18  ;;  %v1898_v59 = vld [vmem:[#allocation3 + $0x1e0] sm:$0xff]  ;;  %v1881_v61 = vld [vmem:[#allocation3 + $0x158] sm:$0xff]  ;;  %v1872_v0 = vld [vmem:[#allocation3 + $0x110] sm:$0xff] }
  0x20   :  { %642 = vmatpush.bf16.msra.mxu3 %v1865_v19  ;;  %v1889_v62 = vld [vmem:[#allocation3 + $0x198] sm:$0xff]  ;;  %v1880_v1 = vld [vmem:[#allocation3 + $0x150] sm:$0xff]  ;;  %v1871_v4 = vld [vmem:[#allocation3 + $0x108] sm:$0xff] }
  0x21   :  { %601 = vmatpush.bf16.msra.mxu0 %v1840_v20  ;;  %v1897_v63 = vld [vmem:[#allocation3 + $0x1d8] sm:$0xff]  ;;  %v1888_v2 = vld [vmem:[#allocation3 + $0x190] sm:$0xff]  ;;  %v1879_v5 = vld [vmem:[#allocation3 + $0x148] sm:$0xff] }
  0x22   :  { %615 = vmatpush.bf16.msra.mxu1 %v1848_v21  ;;  %v1896_v3 = vld [vmem:[#allocation3 + $0x1d0] sm:$0xff]  ;;  %v1887_v6 = vld [vmem:[#allocation3 + $0x188] sm:$0xff]  ;;  %v1870_v8 = vld [vmem:[#allocation3 + $0x100] sm:$0xff] }
  0x23   :  { %629 = vmatpush.bf16.msra.mxu2 %v1856_v22  ;;  %v1895_v7 = vld [vmem:[#allocation3 + $0x1c8] sm:$0xff]  ;;  %v1878_v9 = vld [vmem:[#allocation3 + $0x140] sm:$0xff]  ;;  %v60_v12 = vld [vmem:[%s2224_s0 + $0x20] sm:$0xff] }
  0x24   :  { %643 = vmatpush.bf16.msra.mxu3 %v1864_v23  ;;  %v1886_v10 = vld [vmem:[#allocation3 + $0x180] sm:$0xff]  ;;  %v68_v13 = vld [vmem:[%s2224_s0 + $0x60] sm:$0xff]  ;;  %v62_v16 = vld [vmem:[%s2224_s0 + $0x30] sm:$0xff] }
  0x25   :  { %602 = vmatpush.bf16.msra.mxu0 %v1839_v24  ;;  %v1894_v11 = vld [vmem:[#allocation3 + $0x1c0] sm:$0xff]  ;;  %v70_v17 = vld [vmem:[%s2224_s0 + $0x70] sm:$0xff]  ;;  %v63_v18 = vld [vmem:[%s2224_s0 + $0x38] sm:$0xff]  ;;  %v76_v20 = vpack.c.bf16 %v68_v13, %v60_v12 }
  0x26   :  { %616 = vmatpush.bf16.msra.mxu1 %v1847_v25  ;;  %v61_v14 = vld [vmem:[%s2224_s0 + $0x28] sm:$0xff]  ;;  %v71_v19 = vld [vmem:[%s2224_s0 + $0x78] sm:$0xff]  ;;  %v78_v22 = vpack.c.bf16 %v70_v17, %v62_v16  ;;  %v1818_v34 = vld [vmem:[#allocation5 + $0x1e8] sm:$0xf0] }
  0x27   :  { %630 = vmatpush.bf16.msra.mxu2 %v1855_v26  ;;  %v69_v15 = vld [vmem:[%s2224_s0 + $0x68] sm:$0xff]  ;;  %v79_v23 = vpack.c.bf16 %v71_v19, %v63_v18  ;;  %v1784_v41 = vld [vmem:[#allocation5 + $0x188] sm:$0xf]  ;;  %v1928_v17 = vld [vmem:[#allocation5 + $0xcc] sm:$0xf] }
  0x28   :  { %644 = vmatpush.bf16.msra.mxu3 %v1863_v27  ;;  %v77_v21 = vpack.c.bf16 %v69_v15, %v61_v14  ;;  %v1808_v24 = vld [vmem:[#allocation5 + $0x1c0] sm:$0xf]  ;;  %v1959_v26 = vld [vmem:[#allocation5 + $0x1c4] sm:$0xf]  ;;  %v1688_v13 = vld [vmem:[#allocation5 + $0xc8] sm:$0xf] }
  0x29   :  { %603 = vmatpush.bf16.msra.mxu0 %v1838_v28  ;;  %v1963_v25 = vld [vmem:[#allocation5 + $0x1dc] sm:$0xf0]  ;;  %v1810_v28 = vld [vmem:[#allocation5 + $0x1e0] sm:$0xf0]  ;;  %v1932_v14 = vld [vmem:[#allocation5 + $0xe4] sm:$0xf0] }
  0x2a   :  { %617 = vmatpush.bf16.msra.mxu1 %v1846_v29  ;;  %v1809_v27 = vor.u32 %v1963_v25, %v1808_v24  ;;  %v1816_v29 = vld [vmem:[#allocation5 + $0x1c8] sm:$0xf]  ;;  %v1776_v36 = vld [vmem:[#allocation5 + $0x180] sm:$0xf]  ;;  %v1951_v38 = vld [vmem:[#allocation5 + $0x184] sm:$0xf]  ;;  %v1689_v16 = vor.u32 %v1932_v14, %v1688_v13 }
  0x2b   :  { %631 = vmatpush.bf16.msra.mxu2 %v1854_v30  ;;  %v1964_v30 = vld [vmem:[#allocation5 + $0x1e4] sm:$0xf0]  ;;  %v1955_v37 = vld [vmem:[#allocation5 + $0x19c] sm:$0xf0]  ;;  %v1778_v40 = vld [vmem:[#allocation5 + $0x1a0] sm:$0xf0] }
  0x2c   :  { %645 = vmatpush.bf16.msra.mxu3 %v1862_v31  ;;  %604 = vmatmul.bf16.vlgmr.msra.gmra.mxu0 %v72_v45  ;;  %v1813_v31 = vor.u32 %v1959_v26, %v1810_v28  ;;  %v1777_v39 = vor.u32 %v1955_v37, %v1776_v36  ;;  %v1952_v45 = vld [vmem:[#allocation5 + $0x18c] sm:$0xf]  ;;  %v1682_v12 = vld [vmem:[#allocation5 + $0xe0] sm:$0xf0]  ;;  %v1656_v25 = vld [vmem:[#allocation5 + $0x88] sm:$0xf] }
  0x2d   :  { %652 = vmatpush.bf16.msrb.mxu0 %v1877_v32  ;;  %618 = vmatmul.bf16.vlgmr.msra.gmra.mxu1 %v73_v47  ;;  %v1817_v32 = vor.u32 %v1964_v30, %v1816_v29  ;;  %v1744_v47 = vld [vmem:[#allocation5 + $0x140] sm:$0xf]  ;;  %v1690_v18 = vld [vmem:[#allocation5 + $0xe8] sm:$0xf0]  ;;  %v1650_v24 = vld [vmem:[#allocation5 + $0xa0] sm:$0xf0] }
  0x2e   :  { %666 = vmatpush.bf16.msrb.mxu1 %v1885_v33  ;;  %632 = vmatmul.bf16.vlgmr.msra.gmra.mxu2 %v74_v44  ;;  %v1960_v33 = vld [vmem:[#allocation5 + $0x1cc] sm:$0xf]  ;;  %v1693_v19 = vor.u32 %v1928_v17, %v1690_v18  ;;  %v1924_v26 = vld [vmem:[#allocation5 + $0xa4] sm:$0xf0]  ;;  %v1618_v36 = vld [vmem:[#allocation5 + $0x60] sm:$0xf0] }
  0x2f   :  { %680 = vmatpush.bf16.msrb.mxu2 %v1893_v42  ;;  %646 = vmatmul.bf16.vlgmr.msra.gmra.mxu3 %v75_v46  ;;  %v1821_v35 = vor.u32 %v1960_v33, %v1818_v34  ;;  %v1956_v42 = vld [vmem:[#allocation5 + $0x1a4] sm:$0xf0]  ;;  %v1786_v46 = vld [vmem:[#allocation5 + $0x1a8] sm:$0xf0]  ;;  %v1657_v28 = vor.u32 %v1924_v26, %v1656_v25  ;;  %v1915_v33 = vld [vmem:[#allocation5 + $0x5c] sm:$0xf0] }
  0x30   :  { %694 = vmatpush.bf16.msrb.mxu3 %v1901_v43  ;;  %v1781_v43 = vor.u32 %v1951_v38, %v1778_v40  ;;  %v1785_v44 = vor.u32 %v1956_v42, %v1784_v41  ;;  %v1920_v29 = vld [vmem:[#allocation5 + $0x8c] sm:$0xf]  ;;  %v1911_v34 = vld [vmem:[#allocation5 + $0x44] sm:$0xf]  ;;  %v1624_v37 = vld [vmem:[#allocation5 + $0x48] sm:$0xf] }
  0x31   :  { %653 = vmatpush.bf16.msrb.mxu0 %v1876_v48  ;;  %v1789_v48 = vor.u32 %v1952_v45, %v1786_v46  ;;  %v1658_v30 = vld [vmem:[#allocation5 + $0xa8] sm:$0xf0]  ;;  %v1916_v38 = vld [vmem:[#allocation5 + $0x64] sm:$0xf0]  ;;  %v1584_v45 = vld [vmem:[#allocation5] sm:$0xf] }
  0x32   :  { %667 = vmatpush.bf16.msrb.mxu1 %v1884_v49  ;;  %v1947_v49 = vld [vmem:[#allocation5 + $0x15c] sm:$0xf0]  ;;  %v1625_v40 = vor.u32 %v1916_v38, %v1624_v37  ;;  %v1912_v41 = vld [vmem:[#allocation5 + $0x4c] sm:$0xf]  ;;  %v1954_v17 = vld [vmem:[#allocation5 + $0x19c] sm:$0xf] }
  0x33   :  { %681 = vmatpush.bf16.msrb.mxu2 %v1892_v50  ;;  %v1943_v50 = vld [vmem:[#allocation5 + $0x144] sm:$0xf]  ;;  %v1626_v42 = vld [vmem:[#allocation5 + $0x68] sm:$0xf0]  ;;  %v1907_v46 = vld [vmem:[#allocation5 + $0x1c] sm:$0xf0] }
  0x34   :  { %695 = vmatpush.bf16.msrb.mxu3 %v1900_v51  ;;  %v1746_v51 = vld [vmem:[#allocation5 + $0x160] sm:$0xf0]  ;;  %v1802_v18 = vld [vmem:[#allocation5 + $0x1b8] sm:$0xf0]  ;;  %v1937_v37 = vld [vmem:[#allocation5 + $0x114] sm:$0xf] }
  0x35   :  { %654 = vmatpush.bf16.msrb.mxu0 %v1875_v52  ;;  %v1745_v52 = vor.u32 %v1947_v49, %v1744_v47  ;;  %v1903_v47 = vld [vmem:[#allocation5 + $0x4] sm:$0xf]  ;;  %v1730_v38 = vld [vmem:[#allocation5 + $0x130] sm:$0xf0] }
  0x36   :  { %668 = vmatpush.bf16.msrb.mxu1 %v1883_v53  ;;  %v1749_v53 = vor.u32 %v1943_v50, %v1746_v51  ;;  %v1586_v49 = vld [vmem:[#allocation5 + $0x20] sm:$0xf0]  ;;  %v1592_v50 = vld [vmem:[#allocation5 + $0x8] sm:$0xf] }
  0x37   :  { %682 = vmatpush.bf16.msrb.mxu2 %v1891_v54  ;;  %v1752_v54 = vld [vmem:[#allocation5 + $0x148] sm:$0xf] }
  0x38   :  { %696 = vmatpush.bf16.msrb.mxu3 %v1899_v55  ;;  %v1948_v55 = vld [vmem:[#allocation5 + $0x164] sm:$0xf0] }
  0x39   :  { %655 = vmatpush.bf16.msrb.mxu0 %v1874_v56  ;;  %v1944_v56 = vld [vmem:[#allocation5 + $0x14c] sm:$0xf]  ;;  %v1908_v51 = vld [vmem:[#allocation5 + $0x24] sm:$0xf0] }
  0x3a   :  { %669 = vmatpush.bf16.msrb.mxu1 %v1882_v57  ;;  %v1753_v57 = vor.u32 %v1948_v55, %v1752_v54  ;;  %v1904_v54 = vld [vmem:[#allocation5 + $0xc] sm:$0xf] }
  0x3b   :  { %683 = vmatpush.bf16.msrb.mxu2 %v1890_v58  ;;  %v1754_v58 = vld [vmem:[#allocation5 + $0x168] sm:$0xf0] }
  0x3c   :  { %697 = vmatpush.bf16.msrb.mxu3 %v1898_v59  ;;  %v1757_v59 = vor.u32 %v1944_v56, %v1754_v58  ;;  %v1594_v55 = vld [vmem:[#allocation5 + $0x28] sm:$0xf0]  ;;  %v1824_v56 = vld [vmem:[#allocation5 + $0x1d0] sm:$0xf] }
  0x3d   :  { %656 = vmatpush.bf16.msrb.mxu0 %v1873_v60  ;;  %v1712_v60 = vld [vmem:[#allocation5 + $0x100] sm:$0xf] }
  0x3e   :  { %670 = vmatpush.bf16.msrb.mxu1 %v1881_v61  ;;  %v1939_v61 = vld [vmem:[#allocation5 + $0x11c] sm:$0xf0] }
  0x3f   :  { %684 = vmatpush.bf16.msrb.mxu2 %v1889_v62  ;;  %v1935_v62 = vld [vmem:[#allocation5 + $0x104] sm:$0xf] }
  0x40   :  { %698 = vmatpush.bf16.msrb.mxu3 %v1897_v63  ;;  %v1713_v63 = vor.u32 %v1939_v61, %v1712_v60  ;;  %v1965_v60 = vld [vmem:[#allocation5 + $0x1ec] sm:$0xf0]  ;;  %v1961_v61 = vld [vmem:[#allocation5 + $0x1d4] sm:$0xf] }
  0x41   :  { %657 = vmatpush.bf16.msrb.mxu0 %v1872_v0  ;;  %v1714_v0 = vld [vmem:[#allocation5 + $0x120] sm:$0xf0] }
  0x42   :  { %671 = vmatpush.bf16.msrb.mxu1 %v1880_v1  ;;  %v1720_v1 = vld [vmem:[#allocation5 + $0x108] sm:$0xf] }
  0x43   :  { %685 = vmatpush.bf16.msrb.mxu2 %v1888_v2  ;;  %v1940_v2 = vld [vmem:[#allocation5 + $0x124] sm:$0xf0] }
  0x44   :  { %699 = vmatpush.bf16.msrb.mxu3 %v1896_v3  ;;  %v1717_v3 = vor.u32 %v1935_v62, %v1714_v0  ;;  %v1826_v62 = vld [vmem:[#allocation5 + $0x1f0] sm:$0xf0] }
  0x45   :  { %658 = vmatpush.bf16.msrb.mxu0 %v1871_v4  ;;  %v1721_v4 = vor.u32 %v1940_v2, %v1720_v1  ;;  %v1829_v0 = vor.u32 %v1961_v61, %v1826_v62  ;;  %v1832_v1 = vld [vmem:[#allocation5 + $0x1d8] sm:$0xf] }
  0x46   :  { %672 = vmatpush.bf16.msrb.mxu1 %v1879_v5  ;;  %v1936_v5 = vld [vmem:[#allocation5 + $0x10c] sm:$0xf]  ;;  %v1966_v2 = vld [vmem:[#allocation5 + $0x1f4] sm:$0xf0] }
  0x47   :  { %686 = vmatpush.bf16.msrb.mxu2 %v1887_v6  ;;  %v1722_v6 = vld [vmem:[#allocation5 + $0x128] sm:$0xf0]  ;;  %v1934_v61 = vld [vmem:[#allocation5 + $0xf4] sm:$0xf0] }
  0x48   :  { %700 = vmatpush.bf16.msrb.mxu3 %v1895_v7  ;;  %v1725_v7 = vor.u32 %v1936_v5, %v1722_v6  ;;  %v1834_v5 = vld [vmem:[#allocation5 + $0x1f8] sm:$0xf0]  ;;  %v1792_v6 = vld [vmem:[#allocation5 + $0x190] sm:$0xf] }
  0x49   :  { %659 = vmatpush.bf16.msrb.mxu0 %v1870_v8  ;;  %v1680_v8 = vld [vmem:[#allocation5 + $0xc0] sm:$0xf] }
  0x4a   :  { %673 = vmatpush.bf16.msrb.mxu1 %v1878_v9  ;;  %v1931_v9 = vld [vmem:[#allocation5 + $0xdc] sm:$0xf0] }
  0x4b   :  { %687 = vmatpush.bf16.msrb.mxu2 %v1886_v10  ;;  %v1927_v10 = vld [vmem:[#allocation5 + $0xc4] sm:$0xf] }
  0x4c   :  { %701 = vmatpush.bf16.msrb.mxu3 %v1894_v11  ;;  %660 = vmatmul.bf16.vlgmr.msrb.gmra.mxu0 %v76_v20  ;;  %v1681_v11 = vor.u32 %v1931_v9, %v1680_v8  ;;  %v1685_v15 = vor.u32 %v1927_v10, %v1682_v12  ;;  %v1648_v20 = vld [vmem:[#allocation5 + $0x80] sm:$0xf]  ;;  %v1953_v10 = vld [vmem:[#allocation5 + $0x194] sm:$0xf]  ;;  %v1800_v12 = vld [vmem:[#allocation5 + $0x198] sm:$0xf] }
  0x4d   :  { %674 = vmatmul.bf16.vlgmr.msrb.gmra.mxu1 %v77_v21  ;;  %1124 = vmatpush.bf16.msra.mxu0 %v1809_v27  ;;  %v1923_v21 = vld [vmem:[#allocation5 + $0x9c] sm:$0xf0] }
  0x4e   :  { %688 = vmatmul.bf16.vlgmr.msrb.gmra.mxu2 %v78_v22  ;;  %1138 = vmatpush.bf16.msra.mxu1 %v1813_v31  ;;  %v1919_v22 = vld [vmem:[#allocation5 + $0x84] sm:$0xf]  ;;  %v1661_v31 = vor.u32 %v1920_v29, %v1658_v30  ;;  %v1950_v29 = vld [vmem:[#allocation5 + $0x174] sm:$0xf0] }
  0x4f   :  { %702 = vmatmul.bf16.vlgmr.msrb.gmra.mxu3 %v79_v23  ;;  %1152 = vmatpush.bf16.msra.mxu2 %v1817_v32  ;;  %v1649_v23 = vor.u32 %v1923_v21, %v1648_v20  ;;  %v1653_v27 = vor.u32 %v1919_v22, %v1650_v24  ;;  %v1616_v32 = vld [vmem:[#allocation5 + $0x40] sm:$0xf]  ;;  %v1805_v20 = vor.u32 %v1954_v17, %v1802_v18  ;;  %v1760_v22 = vld [vmem:[#allocation5 + $0x150] sm:$0xf]  ;;  %v1945_v24 = vld [vmem:[#allocation5 + $0x154] sm:$0xf] }
  0x50   :  { %1166 = vmatpush.bf16.msra.mxu3 %v1821_v35  ;;  %v1617_v35 = vor.u32 %v1915_v33, %v1616_v32  ;;  %v1946_v32 = vld [vmem:[#allocation5 + $0x15c] sm:$0xf]  ;;  %v1632_v18 = vld [vmem:[#allocation5 + $0x50] sm:$0xf] }
  0x51   :  { %1125 = vmatpush.bf16.msra.mxu0 %v1777_v39  ;;  %v1621_v39 = vor.u32 %v1911_v34, %v1618_v36  ;;  %v1770_v33 = vld [vmem:[#allocation5 + $0x178] sm:$0xf0]  ;;  %v1728_v34 = vld [vmem:[#allocation5 + $0x110] sm:$0xf] }
  0x52   :  { %1139 = vmatpush.bf16.msra.mxu1 %v1781_v43  ;;  %v1629_v43 = vor.u32 %v1912_v41, %v1626_v42  ;;  %v1941_v36 = vld [vmem:[#allocation5 + $0x12c] sm:$0xf0]  ;;  %v1736_v41 = vld [vmem:[#allocation5 + $0x118] sm:$0xf]  ;;  %v1674_v17 = vld [vmem:[#allocation5 + $0xb8] sm:$0xf0] }
  0x53   :  { %1153 = vmatpush.bf16.msra.mxu2 %v1785_v44  ;;  %v1942_v42 = vld [vmem:[#allocation5 + $0x134] sm:$0xf0] }
  0x54   :  { %1167 = vmatpush.bf16.msra.mxu3 %v1789_v48  ;;  %v1585_v48 = vor.u32 %v1907_v46, %v1584_v45  ;;  %v1729_v45 = vor.u32 %v1941_v36, %v1728_v34  ;;  %v1733_v46 = vor.u32 %v1937_v37, %v1730_v38  ;;  %v1905_v36 = vld [vmem:[#allocation5 + $0x14] sm:$0xf] }
  0x55   :  { %1126 = vmatpush.bf16.msra.mxu0 %v1745_v52  ;;  %v1589_v52 = vor.u32 %v1903_v47, %v1586_v49  ;;  %v1738_v47 = vld [vmem:[#allocation5 + $0x138] sm:$0xf0]  ;;  %v1602_v37 = vld [vmem:[#allocation5 + $0x30] sm:$0xf0] }
  0x56   :  { %1140 = vmatpush.bf16.msra.mxu1 %v1749_v53  ;;  %v1593_v53 = vor.u32 %v1908_v51, %v1592_v50 }
  0x57   :  { %1154 = vmatpush.bf16.msra.mxu2 %v1753_v57  ;;  %v2156_v57 = vld [vmem:[%s2226_s2] ss:$0 sm:$0xff] }
  0x58   :  { %1168 = vmatpush.bf16.msra.mxu3 %v1757_v59  ;;  %v1597_v59 = vor.u32 %v1904_v54, %v1594_v55  ;;  %v1696_v55 = vld [vmem:[#allocation5 + $0xd0] sm:$0xf] }
  0x59   :  { %1127 = vmatpush.bf16.msra.mxu0 %v1713_v63  ;;  %v1825_v63 = vor.u32 %v1965_v60, %v1824_v56  ;;  %v1933_v56 = vld [vmem:[#allocation5 + $0xec] sm:$0xf0]  ;;  %v1704_v60 = vld [vmem:[#allocation5 + $0xd8] sm:$0xf] }
  0x5a   :  { %1141 = vmatpush.bf16.msra.mxu1 %v1717_v3  ;;  %v1962_v3 = vld [vmem:[#allocation5 + $0x1dc] sm:$0xf] }
  0x5b   :  { %1155 = vmatpush.bf16.msra.mxu2 %v1721_v4  ;;  %v1833_v4 = vor.u32 %v1966_v2, %v1832_v1  ;;  %v1837_v8 = vor.u32 %v1962_v3, %v1834_v5  ;;  %v1706_v1 = vld [vmem:[#allocation5 + $0xf8] sm:$0xf0]  ;;  %v1664_v2 = vld [vmem:[#allocation5 + $0x90] sm:$0xf] }
  0x5c   :  { %1169 = vmatpush.bf16.msra.mxu3 %v1725_v7  ;;  %v1957_v7 = vld [vmem:[#allocation5 + $0x1ac] sm:$0xf0] }
  0x5d   :  { %1128 = vmatpush.bf16.msra.mxu0 %v1681_v11  ;;  %v1793_v9 = vor.u32 %v1957_v7, %v1792_v6  ;;  %v1794_v11 = vld [vmem:[#allocation5 + $0x1b0] sm:$0xf0]  ;;  %v1925_v6 = vld [vmem:[#allocation5 + $0xac] sm:$0xf0] }
  0x5e   :  { %1142 = vmatpush.bf16.msra.mxu1 %v1685_v15  ;;  %v1797_v15 = vor.u32 %v1953_v10, %v1794_v11  ;;  %v1921_v7 = vld [vmem:[#allocation5 + $0x94] sm:$0xf]  ;;  %v1665_v10 = vor.u32 %v1925_v6, %v1664_v2 }
  0x5f   :  { %1156 = vmatpush.bf16.msra.mxu2 %v1689_v16  ;;  %v1958_v16 = vld [vmem:[#allocation5 + $0x1b4] sm:$0xf0] }
  0x60   :  { %1170 = vmatpush.bf16.msra.mxu3 %v1693_v19  ;;  %v1801_v19 = vor.u32 %v1958_v16, %v1800_v12  ;;  %v1672_v12 = vld [vmem:[#allocation5 + $0x98] sm:$0xf] }
  0x61   :  { %1129 = vmatpush.bf16.msra.mxu0 %v1649_v23  ;;  %v1949_v23 = vld [vmem:[#allocation5 + $0x16c] sm:$0xf0] }
  0x62   :  { %1143 = vmatpush.bf16.msra.mxu1 %v1653_v27  ;;  %v1761_v26 = vor.u32 %v1949_v23, %v1760_v22  ;;  %v1762_v27 = vld [vmem:[#allocation5 + $0x170] sm:$0xf0]  ;;  %v1640_v23 = vld [vmem:[#allocation5 + $0x58] sm:$0xf] }
  0x63   :  { %1157 = vmatpush.bf16.msra.mxu2 %v1657_v28  ;;  %v1768_v28 = vld [vmem:[#allocation5 + $0x158] sm:$0xf]  ;;  %v1765_v30 = vor.u32 %v1945_v24, %v1762_v27  ;;  %v1634_v22 = vld [vmem:[#allocation5 + $0x70] sm:$0xf0]  ;;  %v1914_v27 = vld [vmem:[#allocation5 + $0x5c] sm:$0xf] }
  0x64   :  { %1171 = vmatpush.bf16.msra.mxu3 %v1661_v31  ;;  %v1769_v31 = vor.u32 %v1950_v29, %v1768_v28  ;;  %v1642_v28 = vld [vmem:[#allocation5 + $0x78] sm:$0xf0] }
  0x65   :  { %1130 = vmatpush.bf16.msra.mxu0 %v1617_v35  ;;  %v1773_v35 = vor.u32 %v1946_v32, %v1770_v33  ;;  %v1600_v33 = vld [vmem:[#allocation5 + $0x10] sm:$0xf] }
  0x66   :  { %1144 = vmatpush.bf16.msra.mxu1 %v1621_v39 }
  0x67   :  { %1158 = vmatpush.bf16.msra.mxu2 %v1625_v40 }
  0x68   :  { %1172 = vmatpush.bf16.msra.mxu3 %v1629_v43  ;;  %v1938_v43 = vld [vmem:[#allocation5 + $0x11c] sm:$0xf] }
  0x69   :  { %1131 = vmatpush.bf16.msra.mxu0 %v1585_v48  ;;  %v1737_v48 = vor.u32 %v1942_v42, %v1736_v41  ;;  %v1741_v49 = vor.u32 %v1938_v43, %v1738_v47  ;;  %v1608_v41 = vld [vmem:[#allocation5 + $0x18] sm:$0xf]  ;;  %v1906_v43 = vld [vmem:[#allocation5 + $0x1c] sm:$0xf]  ;;  %v1605_v47 = vor.u32 %v1905_v36, %v1602_v37 }
  0x6a   :  { %1145 = vmatpush.bf16.msra.mxu1 %v1589_v52  ;;  %v1910_v42 = vld [vmem:[#allocation5 + $0x34] sm:$0xf0] }
  0x6b   :  { %1159 = vmatpush.bf16.msra.mxu2 %v1593_v53 }
  0x6c   :  { %1173 = vmatpush.bf16.msra.mxu3 %v1597_v59  ;;  %v1698_v59 = vld [vmem:[#allocation5 + $0xf0] sm:$0xf0] }
  0x6d   :  { %1180 = vmatpush.bf16.msrb.mxu0 %v1825_v63  ;;  %v1705_v63 = vor.u32 %v1934_v61, %v1704_v60  ;;  %v2166_v61 = vld [vmem:[%s2228_s4] sm:$0xff] }
  0x6e   :  { %1194 = vmatpush.bf16.msrb.mxu1 %v1829_v0  ;;  %v1930_v0 = vld [vmem:[#allocation5 + $0xdc] sm:$0xf]  ;;  %v784_v6 = vperm.slane %v2166_v61, 2 }
  0x6f   :  { %1208 = vmatpush.bf16.msrb.mxu2 %v1833_v4  ;;  %v1709_v5 = vor.u32 %v1930_v0, %v1706_v1 }
  0x70   :  { %1222 = vmatpush.bf16.msrb.mxu3 %v1837_v8  ;;  %v1666_v8 = vld [vmem:[#allocation5 + $0xb0] sm:$0xf0] }
  0x71   :  { %1181 = vmatpush.bf16.msrb.mxu0 %v1793_v9  ;;  %v1669_v11 = vor.u32 %v1921_v7, %v1666_v8  ;;  %v785_v7 = vperm.slane %v2166_v61, 3 }
  0x72   :  { %1195 = vmatpush.bf16.msrb.mxu1 %v1797_v15  ;;  %v1922_v15 = vld [vmem:[#allocation5 + $0x9c] sm:$0xf] }
  0x73   :  { %1209 = vmatpush.bf16.msrb.mxu2 %v1801_v19  ;;  %v1917_v19 = vld [vmem:[#allocation5 + $0x6c] sm:$0xf0] }
  0x74   :  { %1223 = vmatpush.bf16.msrb.mxu3 %v1805_v20 }
  0x75   :  { %1182 = vmatpush.bf16.msrb.mxu0 %v1761_v26  ;;  %v1918_v26 = vld [vmem:[#allocation5 + $0x74] sm:$0xf0] }
  0x76   :  { %1196 = vmatpush.bf16.msrb.mxu1 %v1765_v30  ;;  %v1641_v34 = vor.u32 %v1918_v26, %v1640_v23 }
  0x77   :  { %1210 = vmatpush.bf16.msrb.mxu2 %v1769_v31  ;;  %v1633_v31 = vor.u32 %v1917_v19, %v1632_v18 }
  0x78   :  { %1224 = vmatpush.bf16.msrb.mxu3 %v1773_v35  ;;  %v1909_v35 = vld [vmem:[#allocation5 + $0x2c] sm:$0xf0] }
  0x79   :  { %1183 = vmatpush.bf16.msrb.mxu0 %v1729_v45 }
  0x7a   :  { %1197 = vmatpush.bf16.msrb.mxu1 %v1733_v46  ;;  %v1601_v46 = vor.u32 %v1909_v35, %v1600_v33 }
  0x7b   :  { %1211 = vmatpush.bf16.msrb.mxu2 %v1737_v48 }
  0x7c   :  { %1225 = vmatpush.bf16.msrb.mxu3 %v1741_v49  ;;  %v1609_v49 = vor.u32 %v1910_v42, %v1608_v41 }
  0x7f   :  { %1212 = vmatpush.bf16.msrb.mxu2 %v1705_v63  ;;  %v783_v63 = vperm.slane %v2166_v61, 1 }
  0x80   :  { %1226 = vmatpush.bf16.msrb.mxu3 %v1709_v5 }
  0xa9   :  { %v605_v44 = vpop.f32.mrf.mxu0 }
  0xaa   :  { %v619_v58 = vpop.f32.mrf.mxu1  ;;  %v606_v21 = vadd.f32 %v2156_v57, %v605_v44 }
  0xac   :  { %v620_v39 = vadd.f32 %v619_v58, %v606_v21  ;;  %v1929_v58 = vld [vmem:[#allocation5 + $0xd4] sm:$0xf] }
  0xad   :  { %v1701_v62 = vor.u32 %v1929_v58, %v1698_v59  ;;  %v1913_v21 = vld [vmem:[#allocation5 + $0x54] sm:$0xf] }
  0xae   :  { %v1637_v32 = vor.u32 %v1913_v21, %v1634_v22 }
  0xaf   :  { %1198 = vmatpush.bf16.msrb.mxu1 %v1701_v62  ;;  %v782_v62 = vperm.slane %v2166_v61, 0 }
  0xb1   :  { %v633_v13 = vpop.f32.mrf.mxu2  ;;  %v607_v25 = vpop.f32.mrf.mxu0 }
  0xb2   :  { %v2158_v14 = vpop.f32.mrf.mxu3  ;;  %v621_v40 = vpop.f32.mrf.mxu1  ;;  %v608_v44 = vadd.f32 %v2156_v57, %v607_v25  ;;  %v634_v50 = vadd.f32 %v633_v13, %v620_v39  ;;  %v1697_v57 = vor.u32 %v1933_v56, %v1696_v55  ;;  %v1926_v13 = vld [vmem:[#allocation5 + $0xb4] sm:$0xf0] }
  0xb3   :  { %v1673_v16 = vor.u32 %v1926_v13, %v1672_v12  ;;  %1199 = vmatpush.bf16.msrb.mxu1 %v1669_v11 }
  0xb4   :  { %v622_v53 = vadd.f32 %v621_v40, %v608_v44  ;;  %v648_v3 = vadd.f32 %v2158_v14, %v634_v50  ;;  %1184 = vmatpush.bf16.msrb.mxu0 %v1697_v57  ;;  %v1677_v14 = vor.u32 %v1922_v15, %v1674_v17  ;;  %v1645_v40 = vor.u32 %v1914_v27, %v1642_v28  ;;  %v1610_v44 = vld [vmem:[#allocation5 + $0x38] sm:$0xf0] }
  0xb5   :  { %1213 = vmatpush.bf16.msrb.mxu2 %v1673_v16 }
  0xb6   :  { %1227 = vmatpush.bf16.msrb.mxu3 %v1677_v14 }
  0xb7   :  { %1200 = vmatpush.bf16.msrb.mxu1 %v1637_v32 }
  0xb8   :  { %1185 = vmatpush.bf16.msrb.mxu0 %v1665_v10 }
  0xb9   :  { %v635_v51 = vpop.f32.mrf.mxu2  ;;  %1214 = vmatpush.bf16.msrb.mxu2 %v1641_v34 }
  0xba   :  { %v649_v52 = vpop.f32.mrf.mxu3  ;;  %v636_v9 = vadd.f32 %v635_v51, %v622_v53  ;;  %1228 = vmatpush.bf16.msrb.mxu3 %v1645_v40  ;;  %v1613_v51 = vor.u32 %v1906_v43, %v1610_v44 }
  0xbb   :  { %1201 = vmatpush.bf16.msrb.mxu1 %v1605_v47 }
  0xbc   :  { %v650_v29 = vadd.f32 %v649_v52, %v636_v9  ;;  %1186 = vmatpush.bf16.msrb.mxu0 %v1633_v31 }
  0xbd   :  { %1215 = vmatpush.bf16.msrb.mxu2 %v1609_v49 }
  0xbe   :  { %1229 = vmatpush.bf16.msrb.mxu3 %v1613_v51 }
  0xc0   :  { %1187 = vmatpush.bf16.msrb.mxu0 %v1601_v46  ;;  %v789_v46 = vperm.slane %v2166_v61, 7 }
  0xc9   :  { %v661_v54 = vpop.f32.mrf.mxu0 }
  0xca   :  { %v675_v4 = vpop.f32.mrf.mxu1  ;;  %v662_v20 = vadd.f32 %v661_v54, %v648_v3 }
  0xcc   :  { %v676_v38 = vadd.f32 %v675_v4, %v662_v20 }
  0xd1   :  { %v689_v24 = vpop.f32.mrf.mxu2  ;;  %v663_v30 = vpop.f32.mrf.mxu0 }
  0xd2   :  { %v703_v25 = vpop.f32.mrf.mxu3  ;;  %v664_v39 = vadd.f32 %v663_v30, %v650_v29  ;;  %v690_v45 = vadd.f32 %v689_v24, %v676_v38  ;;  %v677_v48 = vpop.f32.mrf.mxu1  ;;  %v786_v24 = vperm.slane %v2166_v61, 4 }
  0xd4   :  { %v678_v50 = vadd.f32 %v677_v48, %v664_v39  ;;  %v704_v53 = vadd.f32 %v703_v25, %v690_v45  ;;  %v787_v25 = vperm.slane %v2166_v61, 5  ;;  %v788_v45 = vperm.slane %v2166_v61, 6 }
  0xd6   :  { %v708_v58 = vmax.f32 %v704_v53, 0.0 }
  0xd9   :  { %v691_v52 = vpop.f32.mrf.mxu2 }
  0xda   :  { %v692_v54 = vadd.f32 %v691_v52, %v678_v50  ;;  %v705_v55 = vpop.f32.mrf.mxu3 }
  0xdc   :  { %v706_v56 = vadd.f32 %v705_v55, %v692_v54 }
  0xde   :  { %v709_v57 = vmax.f32 %v706_v56, 0.0 }
  0xe0   :  { %v1970_v59 = vpack.c.bf16 %v709_v57, %v708_v58 }
  0xe2   :  { %1971 = vst [vmem:[#allocation2] sm:$0xff] %v1970_v59  }
  0xe9   :  { %v1902_v60 = vld [vmem:[#allocation2] sm:$0xff] }
  0xea   :  { %1132 = vmatmul.bf16.vlgmr.msra.gmra.mxu0 %v1902_v60  ;;  %1146 = vmatmul.bf16.vlgmr.msra.gmra.mxu1 %v1902_v60 }
  0xeb   :  { %1160 = vmatmul.bf16.vlgmr.msra.gmra.mxu2 %v1902_v60  ;;  %1174 = vmatmul.bf16.vlgmr.msra.gmra.mxu3 %v1902_v60 }
  0xfa   :  { %1188 = vmatmul.bf16.vlgmr.msrb.gmra.mxu0 %v1902_v60  ;;  %1202 = vmatmul.bf16.vlgmr.msrb.gmra.mxu1 %v1902_v60 }
  0xfb   :  { %1216 = vmatmul.bf16.vlgmr.msrb.gmra.mxu2 %v1902_v60  ;;  %1230 = vmatmul.bf16.vlgmr.msrb.gmra.mxu3 %v1902_v60 }
 0x167   :  { %v1133_v0 = vpop.f32.mrf.mxu0  ;;  %v1147_v1 = vpop.f32.mrf.mxu1 }
 0x168   :  { %v1134_v2 = vadd.f32 %v1133_v0, %v782_v62  ;;  %v1148_v3 = vadd.f32 %v1147_v1, %v783_v63 }
 0x16a   :  { %v1236_v4 = vmul.f32 0.5, %v1134_v2  ;;  %v1237_v5 = vmul.f32 0.5, %v1148_v3 }
 0x16c   :  { %1979 = vtanh.f32 %v1236_v4 }
 0x16d   :  { %1981 = vtanh.f32 %v1237_v5 }
 0x16e   :  { %v1161_v8 = vpop.f32.mrf.mxu2  ;;  %v1175_v9 = vpop.f32.mrf.mxu3 }
 0x16f   :  { %v1162_v10 = vadd.f32 %v1161_v8, %v784_v6  ;;  %v1176_v11 = vadd.f32 %v1175_v9, %v785_v7  ;;  %v1135_v12 = vpop.f32.mrf.mxu0  ;;  %v1149_v13 = vpop.f32.mrf.mxu1 }
 0x170   :  { %v1136_v15 = vadd.f32 %v1135_v12, %v782_v62  ;;  %v1150_v16 = vadd.f32 %v1149_v13, %v783_v63 }
 0x171   :  { %v1238_v17 = vmul.f32 0.5, %v1162_v10  ;;  %v1239_v18 = vmul.f32 0.5, %v1176_v11 }
 0x172   :  { %v1980_v19 = vpop.eup %1979  ;;  %v1244_v20 = vmul.f32 0.5, %v1136_v15  ;;  %v1245_v14 = vmul.f32 0.5, %v1150_v16 }
 0x173   :  { %v1982_v21 = vpop.eup %1981  ;;  %v1268_v22 = vadd.f32 1.0, %v1980_v19  ;;  %1983 = vtanh.f32 %v1238_v17 }
 0x174   :  { %v1269_v23 = vadd.f32 1.0, %v1982_v21  ;;  %1985 = vtanh.f32 %v1239_v18 }
 0x175   :  { %v1284_v26 = vmul.f32 0.5, %v1268_v22  ;;  %1987 = vtanh.f32 %v1244_v20 }
 0x176   :  { %v1285_v27 = vmul.f32 0.5, %v1269_v23  ;;  %1989 = vtanh.f32 %v1245_v14  ;;  %v1163_v28 = vpop.f32.mrf.mxu2  ;;  %v1177_v29 = vpop.f32.mrf.mxu3 }
 0x177   :  { %1300 = vst [vmem:[%s2229_s5] sm:$0xff] %v1284_v26  ;;  %v1164_v30 = vadd.f32 %v1163_v28, %v784_v6  ;;  %v1178_v31 = vadd.f32 %v1177_v29, %v785_v7  ;;  %v1189_v32 = vpop.f32.mrf.mxu0  ;;  %v1203_v33 = vpop.f32.mrf.mxu1 }
 0x178   :  { %1301 = vst [vmem:[%s2229_s5 + $0x8] sm:$0xff] %v1285_v27  ;;  %v1190_v34 = vadd.f32 %v1189_v32, %v786_v24  ;;  %v1204_v35 = vadd.f32 %v1203_v33, %v787_v25 }
 0x179   :  { %v1984_v36 = vpop.eup %1983  ;;  %v1246_v37 = vmul.f32 0.5, %v1164_v30  ;;  %v1247_v38 = vmul.f32 0.5, %v1178_v31 }
 0x17a   :  { %v1986_v39 = vpop.eup %1985  ;;  %v1270_v40 = vadd.f32 1.0, %v1984_v36  ;;  %v1240_v41 = vmul.f32 0.5, %v1190_v34  ;;  %v1241_v42 = vmul.f32 0.5, %v1204_v35 }
 0x17b   :  { %v1988_v43 = vpop.eup %1987  ;;  %v1271_v44 = vadd.f32 1.0, %v1986_v39  ;;  %1991 = vtanh.f32 %v1246_v37 }
 0x17c   :  { %v1990_v47 = vpop.eup %1989  ;;  %v1286_v48 = vmul.f32 0.5, %v1270_v40  ;;  %v1276_v49 = vadd.f32 1.0, %v1988_v43  ;;  %1993 = vtanh.f32 %v1247_v38 }
 0x17d   :  { %v1287_v50 = vmul.f32 0.5, %v1271_v44  ;;  %v1277_v51 = vadd.f32 1.0, %v1990_v47  ;;  %1995 = vtanh.f32 %v1240_v41 }
 0x17e   :  { %1302 = vst [vmem:[%s2229_s5 + $0x10] sm:$0xff] %v1286_v48  ;;  %v1292_v52 = vmul.f32 0.5, %v1276_v49  ;;  %1997 = vtanh.f32 %v1241_v42  ;;  %v1217_v53 = vpop.f32.mrf.mxu2  ;;  %v1231_v54 = vpop.f32.mrf.mxu3 }
 0x17f   :  { %1303 = vst [vmem:[%s2229_s5 + $0x18] sm:$0xff] %v1287_v50  ;;  %v1293_v55 = vmul.f32 0.5, %v1277_v51  ;;  %v1218_v56 = vadd.f32 %v1217_v53, %v788_v45  ;;  %v1232_v58 = vadd.f32 %v1231_v54, %v789_v46  ;;  %v1191_v57 = vpop.f32.mrf.mxu0  ;;  %v1205_v59 = vpop.f32.mrf.mxu1 }
 0x180   :  { %1308 = vst [vmem:[%s2229_s5 + $0x40] sm:$0xff] %v1292_v52  ;;  %v1192_v60 = vadd.f32 %v1191_v57, %v786_v24  ;;  %v1206_v61 = vadd.f32 %v1205_v59, %v787_v25 }
 0x181   :  { %v1992_v62 = vpop.eup %1991  ;;  %1309 = vst [vmem:[%s2229_s5 + $0x48] sm:$0xff] %v1293_v55  ;;  %v1242_v63 = vmul.f32 0.5, %v1218_v56  ;;  %v1243_v0 = vmul.f32 0.5, %v1232_v58 }
 0x182   :  { %v1994_v1 = vpop.eup %1993  ;;  %v1278_v2 = vadd.f32 1.0, %v1992_v62  ;;  %v1248_v3 = vmul.f32 0.5, %v1192_v60  ;;  %v1249_v4 = vmul.f32 0.5, %v1206_v61 }
 0x183   :  { %v1996_v5 = vpop.eup %1995  ;;  %v1279_v6 = vadd.f32 1.0, %v1994_v1  ;;  %1999 = vtanh.f32 %v1242_v63 }
 0x184   :  { %v1998_v7 = vpop.eup %1997  ;;  %v1294_v8 = vmul.f32 0.5, %v1278_v2  ;;  %v1272_v9 = vadd.f32 1.0, %v1996_v5  ;;  %2001 = vtanh.f32 %v1243_v0 }
 0x185   :  { %v1295_v10 = vmul.f32 0.5, %v1279_v6  ;;  %v1273_v11 = vadd.f32 1.0, %v1998_v7  ;;  %2003 = vtanh.f32 %v1248_v3 }
 0x186   :  { %1310 = vst [vmem:[%s2229_s5 + $0x50] sm:$0xff] %v1294_v8  ;;  %v1288_v12 = vmul.f32 0.5, %v1272_v9  ;;  %2005 = vtanh.f32 %v1249_v4  ;;  %v1219_v13 = vpop.f32.mrf.mxu2  ;;  %v1233_v15 = vpop.f32.mrf.mxu3 }
 0x187   :  { %1311 = vst [vmem:[%s2229_s5 + $0x58] sm:$0xff] %v1295_v10  ;;  %v1289_v16 = vmul.f32 0.5, %v1273_v11  ;;  %v1220_v17 = vadd.f32 %v1219_v13, %v788_v45  ;;  %v1234_v18 = vadd.f32 %v1233_v15, %v789_v46 }
 0x188   :  { %1304 = vst [vmem:[%s2229_s5 + $0x20] sm:$0xff] %v1288_v12 }
 0x189   :  { %v2000_v19 = vpop.eup %1999  ;;  %1305 = vst [vmem:[%s2229_s5 + $0x28] sm:$0xff] %v1289_v16  ;;  %v1250_v20 = vmul.f32 0.5, %v1220_v17  ;;  %v1251_v14 = vmul.f32 0.5, %v1234_v18 }
 0x18a   :  { %v2002_v21 = vpop.eup %2001  ;;  %v1274_v22 = vadd.f32 1.0, %v2000_v19 }
 0x18b   :  { %v2004_v23 = vpop.eup %2003  ;;  %v1275_v24 = vadd.f32 1.0, %v2002_v21  ;;  %2007 = vtanh.f32 %v1250_v20 }
 0x18c   :  { %v2006_v25 = vpop.eup %2005  ;;  %v1290_v26 = vmul.f32 0.5, %v1274_v22  ;;  %v1280_v27 = vadd.f32 1.0, %v2004_v23  ;;  %2009 = vtanh.f32 %v1251_v14 }
 0x18d   :  { %v1291_v28 = vmul.f32 0.5, %v1275_v24  ;;  %v1281_v29 = vadd.f32 1.0, %v2006_v25 }
 0x18e   :  { %1306 = vst [vmem:[%s2229_s5 + $0x30] sm:$0xff] %v1290_v26  ;;  %v1296_v30 = vmul.f32 0.5, %v1280_v27 }
 0x18f   :  { %1307 = vst [vmem:[%s2229_s5 + $0x38] sm:$0xff] %v1291_v28  ;;  %v1297_v31 = vmul.f32 0.5, %v1281_v29 }
 0x190   :  { %1312 = vst [vmem:[%s2229_s5 + $0x60] sm:$0xff] %v1296_v30 }
 0x191   :  { %v2008_v32 = vpop.eup %2007  ;;  %1313 = vst [vmem:[%s2229_s5 + $0x68] sm:$0xff] %v1297_v31 }
 0x192   :  { %v2010_v33 = vpop.eup %2009  ;;  %v1282_v34 = vadd.f32 1.0, %v2008_v32 }
 0x193   :  { %v1283_v35 = vadd.f32 1.0, %v2010_v33 }
 0x194   :  { %v1298_v36 = vmul.f32 0.5, %v1282_v34 }
 0x195   :  { %v1299_v37 = vmul.f32 0.5, %v1283_v35 }
 0x196   :  { %1314 = vst [vmem:[%s2229_s5 + $0x70] sm:$0xff] %v1298_v36 }
 0x197   :  { %1315 = vst [vmem:[%s2229_s5 + $0x78] sm:$0xff] %v1299_v37 }
 0x198   :  { %1320 = vsyncpa [#allocation4], 1 }
 0x199   :  { %1321 = vsyncpa [#allocation6], 1 }

</bundles_post_ra>
